<compile_context>
chip_gen: v7x
topology: tpu7x:2x2x1
jax: 0.10.0
libtpu: 0.0.40
codegen_flags: <defaults>
</compile_context>

<pallas_src>
import functools

import jax
import jax.numpy as jnp
from jax.experimental import pallas as pl
from jax.experimental.pallas import tpu as pltpu


# ----------------------------------------------------------------------------
# Kernel 1: MAE partial sums.  Each grid step writes an (8, D) partial block;
# the final (tiny) reduction is done in JAX.
# ----------------------------------------------------------------------------
def _mae_partial_kernel(y_ref, t_ref, part_ref):
    d = jnp.abs(y_ref[...] - t_ref[...])                      # (tile_b, D) f32
    # vreg-aligned fold over the row dim: cross-vreg VPU adds only, no XLU
    # scalar reduce in the hot loop.
    part_ref[...] = d.reshape(-1, 8, d.shape[-1]).sum(axis=0)  # (8, D)


def mae_sum(y, target, *, tile_b=2048):
    y = jnp.asarray(y, jnp.float32)
    t = jnp.asarray(target, jnp.float32)
    if y.ndim == 1:
        y = y[:, None]
        t = t[:, None]
    B, D = y.shape
    tile_b = max(8, min(tile_b, ((B + 7) // 8) * 8))
    B_pad = ((B + tile_b - 1) // tile_b) * tile_b
    if B_pad != B:                          # zero pad: |0 - 0| contributes 0
        y = jnp.pad(y, ((0, B_pad - B), (0, 0)))
        t = jnp.pad(t, ((0, B_pad - B), (0, 0)))
    n_tiles = B_pad // tile_b
    parts = pl.pallas_call(
        _mae_partial_kernel,
        out_shape=jax.ShapeDtypeStruct((8 * n_tiles, D), jnp.float32),
        grid=(n_tiles,),
        in_specs=[
            pl.BlockSpec((tile_b, D), lambda i: (i, 0)),
            pl.BlockSpec((tile_b, D), lambda i: (i, 0)),
        ],
        out_specs=pl.BlockSpec((8, D), lambda i: (i, 0)),
        compiler_params=pltpu.CompilerParams(dimension_semantics=("parallel",)),
    )(y, t)
    return jnp.sum(parts)


# ----------------------------------------------------------------------------
# Kernel 2: fused edge-MLP + per-tile KL partial sums, tiled over edges.
#   h        = relu(s @ W1s + r @ W1r + b1)          (split W1 -> no concat)
#   mu       = h @ W2_mu + b2_mu                     (even columns of W2)
#   logvar   = h @ W2_lv + b2_lv                     (odd columns of W2)
#   term     = 0.5 * (mu^2 + exp(logvar) - logvar - 1)
# Each grid step writes an (8, M/2) partial-sum block; final reduce in JAX.
# ----------------------------------------------------------------------------
def _edge_kl_kernel(s_ref, r_ref, w1s_ref, w1r_ref, b1_ref,
                    w2mu_ref, w2lv_ref, b2mu_ref, b2lv_ref, part_ref, *,
                    tile_e, n_edges):
    i = pl.program_id(0)
    mh = part_ref.shape[1]

    # Layer 1: two MXU matmuls (bf16 in, f32 accumulate) + bias + ReLU.
    h = (jnp.dot(s_ref[...], w1s_ref[...], preferred_element_type=jnp.float32)
         + jnp.dot(r_ref[...], w1r_ref[...], preferred_element_type=jnp.float32)
         + b1_ref[...])
    h = jnp.maximum(h, 0.0).astype(s_ref.dtype)

    # Layer 2 split into mu / logvar halves: exp() only on the logvar half,
    # no per-step parity iota/where.
    mu = jnp.dot(h, w2mu_ref[...], preferred_element_type=jnp.float32) + b2mu_ref[...]
    lv = jnp.dot(h, w2lv_ref[...], preferred_element_type=jnp.float32) + b2lv_ref[...]

    term = 0.5 * (mu * mu + jnp.exp(lv) - lv - 1.0)            # (tile_e, M/2) f32

    last = pl.num_programs(0) - 1

    @pl.when(i != last)
    def _():
        # vreg-aligned fold: cross-vreg VPU adds only.
        part_ref[...] = term.reshape(-1, 8, mh).sum(axis=0)

    @pl.when(i == last)
    def _():
        # Only the final tile can contain padded rows -> mask only here.
        row = jax.lax.broadcasted_iota(jnp.int32, term.shape, 0) + i * tile_e
        masked = jnp.where(row < n_edges, term, 0.0)
        part_ref[...] = masked.reshape(-1, 8, mh).sum(axis=0)


def edge_kl_sum(s, r, params, *, tile_e=512, compute_dtype=jnp.bfloat16):
    E, F = s.shape
    w1 = jnp.asarray(params["w1"], jnp.float32)                # (2F, H)
    b1 = jnp.asarray(params["b1"], jnp.float32).reshape(1, -1)  # (1, H)
    w2 = jnp.asarray(params["w2"], jnp.float32)                # (H, M)
    b2 = jnp.asarray(params["b2"], jnp.float32).reshape(1, -1)  # (1, M)
    H = w1.shape[1]
    M = w2.shape[1]
    assert M % 2 == 0, "message dim must be even (interleaved mu/logvar)"
    mh = M // 2

    # One-time weight transforms (free wrapper-side plumbing):
    #   split W1 so the concat(s, r) never has to be materialized,
    #   permute W2/b2 columns so mu / logvar become contiguous halves.
    w1s = w1[:F].astype(compute_dtype)
    w1r = w1[F:].astype(compute_dtype)
    w2mu = w2[:, 0::2].astype(compute_dtype)
    w2lv = w2[:, 1::2].astype(compute_dtype)
    b2mu = b2[:, 0::2]
    b2lv = b2[:, 1::2]

    # Tile sizing: keep double-buffered s/r tiles + f32 intermediates well
    # inside v7x's 64 MiB VMEM (plenty of headroom on v5e/v6e's 128 MiB).
    granule = 16                                   # bf16 sublane packing
    item = jnp.dtype(compute_dtype).itemsize
    bytes_per_row = 2 * F * item * 2               # s + r, double-buffered
    bytes_per_row += (H + 3 * mh) * 4              # h / mu / lv / term f32 temps
    budget = 24 * 1024 * 1024
    cap = max(granule, (budget // max(bytes_per_row, 1)) // granule * granule)
    tile_e = min(tile_e, cap)
    tile_e = max(granule,
                 min(tile_e, ((E + granule - 1) // granule) * granule))
    E_pad = ((E + tile_e - 1) // tile_e) * tile_e
    if E_pad != E:
        s = jnp.pad(s, ((0, E_pad - E), (0, 0)))
        r = jnp.pad(r, ((0, E_pad - E), (0, 0)))
    s = s.astype(compute_dtype)
    r = r.astype(compute_dtype)
    n_tiles = E_pad // tile_e

    kernel = functools.partial(_edge_kl_kernel, tile_e=tile_e, n_edges=E)
    parts = pl.pallas_call(
        kernel,
        out_shape=jax.ShapeDtypeStruct((8 * n_tiles, mh), jnp.float32),
        grid=(n_tiles,),
        in_specs=[
            pl.BlockSpec((tile_e, F), lambda i: (i, 0)),   # s tile
            pl.BlockSpec((tile_e, F), lambda i: (i, 0)),   # r tile
            pl.BlockSpec((F, H), lambda i: (0, 0)),        # W1_src (resident)
            pl.BlockSpec((F, H), lambda i: (0, 0)),        # W1_dst (resident)
            pl.BlockSpec((1, H), lambda i: (0, 0)),        # b1
            pl.BlockSpec((H, mh), lambda i: (0, 0)),       # W2_mu
            pl.BlockSpec((H, mh), lambda i: (0, 0)),       # W2_logvar
            pl.BlockSpec((1, mh), lambda i: (0, 0)),       # b2_mu
            pl.BlockSpec((1, mh), lambda i: (0, 0)),       # b2_logvar
        ],
        out_specs=pl.BlockSpec((8, mh), lambda i: (i, 0)),
        compiler_params=pltpu.CompilerParams(
            dimension_semantics=("parallel",),             # megacore on v7x
            vmem_limit_bytes=48 * 1024 * 1024,
        ),
    )(s, r, w1s, w1r, b1, w2mu, w2lv, b2mu, b2lv)
    return jnp.sum(parts)


# ----------------------------------------------------------------------------
# Forward pass matching MAELossWithKLMessageReg.forward
# ----------------------------------------------------------------------------
def mae_loss_with_kl_message_reg(x, edge_index, y, target, edge_model_params,
                                 reg_weight=1.0, compute_dtype=jnp.bfloat16):
    base_loss = mae_sum(y, target) / y.shape[0]
    total_loss = base_loss
    params_out = {}
    if reg_weight:
        # Edge gather (index plumbing, stays in JAX glue; see TODO above).
        s = jnp.take(x, edge_index[0], axis=0)
        r = jnp.take(x, edge_index[1], axis=0)
        kl_sum = edge_kl_sum(s, r, edge_model_params,
                             compute_dtype=compute_dtype)
        kl_reg = kl_sum / edge_index.shape[1]
        total_loss = total_loss + reg_weight * kl_reg
        params_out = {"kl_reg": kl_reg, "base_loss": base_loss}
    return total_loss, params_out


# ----------------------------------------------------------------------------
# Pure-JAX f32 reference for correctness check
# ----------------------------------------------------------------------------
def _reference(x, edge_index, y, target, p, reg_weight=1.0):
    base_loss = jnp.sum(jnp.abs(y - target)) / y.shape[0]
    s = x[edge_index[0]]
    r = x[edge_index[1]]
    e = jnp.concatenate([s, r], axis=1)
    h = jnp.maximum(e @ p["w1"] + p["b1"], 0.0)
    m = h @ p["w2"] + p["b2"]
    mu = m[:, ::2]
    logvar = m[:, 1::2]
    kl_reg = jnp.sum(0.5 * (mu ** 2 + jnp.exp(logvar) - logvar - 1.0)) / m.shape[0]
    return base_loss + reg_weight * kl_reg, base_loss, kl_reg


if __name__ == "__main__":
    # Small synthetic shapes consistent with the forward pass.
    N, F = 16, 8          # nodes, node feature dim
    E = 32                # edges
    H = 32                # edge-MLP hidden dim
    M = 16                # message dim (even: mu/logvar interleaved)
    B, D = 8, 4           # y / target shape

    key = jax.random.PRNGKey(0)
    kx, ke, ky, kt, k1, k2, k3, k4 = jax.random.split(key, 8)

    x = jax.random.normal(kx, (N, F), dtype=jnp.float32)
    edge_index = jax.random.randint(ke, (2, E), 0, N, dtype=jnp.int32)
    y = jax.random.normal(ky, (B, D), dtype=jnp.float32)
    target = jax.random.normal(kt, (B, D), dtype=jnp.float32)

    # Deterministic synthetic edge_model params (PyTorch-Linear-like uniform init).
    lim1 = 1.0 / jnp.sqrt(2.0 * F)
    lim2 = 1.0 / jnp.sqrt(1.0 * H)
    edge_model_params = {
        "w1": jax.random.uniform(k1, (2 * F, H), jnp.float32, -lim1, lim1),
        "b1": jax.random.uniform(k2, (1, H), jnp.float32, -lim1, lim1),
        "w2": jax.random.uniform(k3, (H, M), jnp.float32, -lim2, lim2),
        "b2": jax.random.uniform(k4, (1, M), jnp.float32, -lim2, lim2),
    }

    ref_total, ref_base, ref_kl = _reference(
        x, edge_index, y, target, edge_model_params, reg_weight=1.0)

    # f32 compute path: bit-close to the reference.
    total32, aux32 = mae_loss_with_kl_message_reg(
        x, edge_index, y, target, edge_model_params, reg_weight=1.0,
        compute_dtype=jnp.float32)
    total32 = jax.block_until_ready(total32)
    assert jnp.allclose(aux32["base_loss"], ref_base, rtol=1e-5, atol=1e-6)
    assert jnp.allclose(aux32["kl_reg"], ref_kl, rtol=1e-5, atol=1e-5)
    assert jnp.allclose(total32, ref_total, rtol=1e-5, atol=1e-5)

    # Default bf16 MXU path: looser tolerance (bf16 inputs, f32 accumulation).
    total, aux = mae_loss_with_kl_message_reg(
        x, edge_index, y, target, edge_model_params, reg_weight=1.0)
    total = jax.block_until_ready(total)
    assert jnp.allclose(aux["base_loss"], ref_base, rtol=1e-5, atol=1e-6)
    assert jnp.allclose(aux["kl_reg"], ref_kl, rtol=5e-2, atol=5e-3)
    assert jnp.allclose(total, ref_total, rtol=5e-2, atol=5e-3)

    print("KERNEL_OK")
</pallas_src>

<mosaic_0001>
module attributes {stable_mosaic.version = 11 : i64} {
  func.func @_mae_partial_kernel(%arg0: i32, %arg1: memref<8x4xf32, #tpu.memory_space<vmem>>, %arg2: memref<8x4xf32, #tpu.memory_space<vmem>>, %arg3: memref<8x4xf32, #tpu.memory_space<vmem>>) attributes {dimension_semantics = [#tpu.dimension_semantics<parallel>], iteration_bounds = array<i64: 1>, scalar_prefetch = 0 : i64, scratch_operands = 0 : i64, tpu.core_type = #tpu.core_type<tc>, window_params = [{transform_indices = @transform_0, window_bounds = array<i64: 8, 4>}, {transform_indices = @transform_1, window_bounds = array<i64: 8, 4>}, {transform_indices = @transform_2, window_bounds = array<i64: 8, 4>}]} {
    %c0 = arith.constant 0 : index
    %c0_0 = arith.constant 0 : index
    %0 = vector.load %arg1[%c0, %c0_0] : memref<8x4xf32, #tpu.memory_space<vmem>>, vector<8x4xf32>
    %c0_1 = arith.constant 0 : index
    %c0_2 = arith.constant 0 : index
    %1 = vector.load %arg2[%c0_1, %c0_2] : memref<8x4xf32, #tpu.memory_space<vmem>>, vector<8x4xf32>
    %2 = arith.subf %0, %1 : vector<8x4xf32>
    %3 = math.absf %2 : vector<8x4xf32>
    %4 = vector.shape_cast %3 : vector<8x4xf32> to vector<1x8x4xf32>
    %cst = arith.constant dense<0.000000e+00> : vector<8x4xf32>
    %5 = vector.multi_reduction <add>, %4, %cst [0] : vector<1x8x4xf32> to vector<8x4xf32>
    %c0_3 = arith.constant 0 : index
    %c0_4 = arith.constant 0 : index
    %6 = vector.load %arg3[%c0_3, %c0_4] : memref<8x4xf32, #tpu.memory_space<vmem>>, vector<8x4xf32>
    tpu.vector_store %arg3[%c0_3, %c0_4], %5 {strides = array<i32>} : memref<8x4xf32, #tpu.memory_space<vmem>>, vector<8x4xf32>,
    return
  }
  func.func @transform_0(%arg0: i32) -> (i32, i32) {
    %c0_i32 = arith.constant 0 : i32
    %c0_i32_0 = arith.constant 0 : i32
    return %arg0, %c0_i32 : i32, i32
  }
  func.func @transform_1(%arg0: i32) -> (i32, i32) {
    %c0_i32 = arith.constant 0 : i32
    %c0_i32_0 = arith.constant 0 : i32
    return %arg0, %c0_i32 : i32, i32
  }
  func.func @transform_2(%arg0: i32) -> (i32, i32) {
    %c0_i32 = arith.constant 0 : i32
    %c0_i32_0 = arith.constant 0 : i32
    return %arg0, %c0_i32 : i32, i32
  }
}

</mosaic_0001>

<bundles_post_ra>
// kernel: tpu_custom_call.1
= control target key start
LH: loop header
LB: loop body
LE: loop exit
PB: predicated region body
PF: predicated region fallthrough
CT: control target
= control target key end

     0   :  { %vm16_vm0 = vcmask 31744   ;;  %s46_s0 = inlined_call_operand.vmem [shape: f32[8,4], index: 0, kind: input, shape index: {}]   ;;  %s47_s1 = inlined_call_operand.vmem [shape: f32[8,4], index: 1, kind: input, shape index: {}]   ;;  %s48_s2 = inlined_call_operand.vmem [shape: f32[8,4], index: 2, kind: output, shape index: {}]  }
   0x1   :  { %v11_v0 = vld [vmem:[%s46_s0] sm:$0xff] }
   0x2   :  { %v12_v1 = vld [vmem:[%s47_s1] sm:$0xff] }
   0x3   :  { %v13_v2 = vsub.f32 %v11_v0, %v12_v1 }
   0x5   :  { %v14_v3 = vand.u32 2147483647, %v13_v2 }
   0x7   :  { %17 = vst.msk [vmem:[%s48_s2] sm:$0xff] %vm16_vm0, %v14_v3 }

</bundles_post_ra>
